<compile_context>
chip_gen: v7x
topology: tpu7x:2x2x1
jax: 0.10.0
libtpu: 0.0.40
codegen_flags: <defaults>
</compile_context>

<pallas_src>
import functools

import jax
import jax.numpy as jnp
from jax.experimental import pallas as pl
from jax.experimental.pallas import tpu as pltpu

INPUT_SIZE = 28 * 28   # 784
HIDDEN = 50
NUM_CLASSES = 10
_BIAS_LANES = 128      # pack b1/b2 into one lane-aligned (2, 128) slab


def mlp_kernel(x_ref, w1_ref, w2_ref, bias_ref, o_ref):
    # fc1 + ReLU   (f32 accumulation on the MXU)
    h = jnp.dot(x_ref[...], w1_ref[...], preferred_element_type=jnp.float32)
    h = h + bias_ref[0:1, 0:HIDDEN]                 # (bm, 50) + (1, 50)
    h = jnp.maximum(h, 0.0)
    # fc2 + sigmoid
    z = jnp.dot(h, w2_ref[...], preferred_element_type=jnp.float32)
    z = z + bias_ref[1:2, 0:NUM_CLASSES]            # (bm, 10) + (1, 10)
    o_ref[...] = jax.nn.sigmoid(z).astype(o_ref.dtype)


def _round_up(x, m):
    return ((x + m - 1) // m) * m


def _choose_bm(B, bm):
    """Pick a batch tile: big (amortize per-step overhead), multiple of 8,
    capped for v7x VMEM, and giving >=2 grid steps when B allows (megacore)."""
    bm = min(bm, 2048)                       # v7x: keep 2*(bm*784*4B) well under scoped VMEM
    bm = max(8, min(bm, _round_up(B, 8)))
    bm = (bm // 8) * 8
    if B >= 16 and pl.cdiv(B, bm) < 2:       # ensure >=2 steps so v7x can use both TCs
        bm = _round_up(pl.cdiv(B, 2), 8)
    return bm


def neural_network_forward(x, w1, b1, w2, b2, *, bm=1024):
    B, D = x.shape
    assert D == INPUT_SIZE
    assert w1.shape == (INPUT_SIZE, HIDDEN)
    assert w2.shape == (HIDDEN, NUM_CLASSES)

    bm = _choose_bm(B, bm)
    num_tiles = pl.cdiv(B, bm)
    B_pad = num_tiles * bm

    # Pack the two tiny biases into one lane-aligned VMEM slab (one DMA stream
    # instead of two).
    bias = jnp.zeros((2, _BIAS_LANES), dtype=jnp.float32)
    bias = bias.at[0, :HIDDEN].set(b1.reshape(-1).astype(jnp.float32))
    bias = bias.at[1, :NUM_CLASSES].set(b2.reshape(-1).astype(jnp.float32))

    x_in = x if B_pad == B else jnp.pad(x, ((0, B_pad - B), (0, 0)))

    out = pl.pallas_call(
        mlp_kernel,
        out_shape=jax.ShapeDtypeStruct((B_pad, NUM_CLASSES), x.dtype),
        grid_spec=pltpu.PrefetchScalarGridSpec(
            num_scalar_prefetch=0,
            grid=(num_tiles,),
            in_specs=[
                pl.BlockSpec((bm, INPUT_SIZE), lambda i: (i, 0)),        # x tile
                pl.BlockSpec((INPUT_SIZE, HIDDEN), lambda i: (0, 0)),    # W1 (full)
                pl.BlockSpec((HIDDEN, NUM_CLASSES), lambda i: (0, 0)),   # W2 (full)
                pl.BlockSpec((2, _BIAS_LANES), lambda i: (0, 0)),        # packed b1|b2
            ],
            out_specs=pl.BlockSpec((bm, NUM_CLASSES), lambda i: (i, 0)),
        ),
        compiler_params=pltpu.CompilerParams(
            dimension_semantics=("parallel",),
            vmem_limit_bytes=32 * 1024 * 1024,   # plenty for bm<=2048, safe on v7x (64 MiB phys)
        ),
    )(x_in, w1, w2, bias)

    return out if B_pad == B else out[:B]


def init_params(key):
    """Deterministic init matching PyTorch nn.Linear default U(-1/sqrt(in), 1/sqrt(in))."""
    k1, k2, k3, k4 = jax.random.split(key, 4)
    bound1 = 1.0 / (INPUT_SIZE ** 0.5)
    bound2 = 1.0 / (HIDDEN ** 0.5)
    w1 = jax.random.uniform(k1, (INPUT_SIZE, HIDDEN), jnp.float32, -bound1, bound1)
    b1 = jax.random.uniform(k2, (1, HIDDEN), jnp.float32, -bound1, bound1)
    w2 = jax.random.uniform(k3, (HIDDEN, NUM_CLASSES), jnp.float32, -bound2, bound2)
    b2 = jax.random.uniform(k4, (1, NUM_CLASSES), jnp.float32, -bound2, bound2)
    return w1, b1, w2, b2


def _reference(x, w1, b1, w2, b2):
    h = jnp.maximum(x @ w1 + b1, 0.0)
    return jax.nn.sigmoid(h @ w2 + b2)


if __name__ == "__main__":
    key = jax.random.PRNGKey(0)
    kx1, kx2, kp = jax.random.split(key, 3)
    w1, b1, w2, b2 = init_params(kp)

    # Case 1: batch divisible by the sublane width (exercises the 2-step grid path).
    B1 = 64
    x1 = jax.random.normal(kx1, (B1, INPUT_SIZE), jnp.float32)
    out1 = jax.block_until_ready(neural_network_forward(x1, w1, b1, w2, b2))
    ref1 = _reference(x1, w1, b1, w2, b2)
    assert out1.shape == (B1, NUM_CLASSES)
    assert jnp.allclose(out1, ref1, atol=1e-5, rtol=1e-5)

    # Case 2: ragged batch (exercises the pad-and-slice path).
    B2 = 50
    x2 = jax.random.normal(kx2, (B2, INPUT_SIZE), jnp.float32)
    out2 = jax.block_until_ready(neural_network_forward(x2, w1, b1, w2, b2))
    ref2 = _reference(x2, w1, b1, w2, b2)
    assert out2.shape == (B2, NUM_CLASSES)
    assert jnp.allclose(out2, ref2, atol=1e-5, rtol=1e-5)

    # TODO(synk): optionally cast x/W1 to bfloat16 (keeping f32 MXU accumulation)
    # to halve HBM traffic on v5e/v6e if the accuracy budget allows.
    print("KERNEL_OK")
</pallas_src>

<mosaic_0001>
module attributes {stable_mosaic.version = 11 : i64} {
  func.func @mlp_kernel(%arg0: i32, %arg1: memref<32x784xf32, #tpu.memory_space<vmem>>, %arg2: memref<784x50xf32, #tpu.memory_space<vmem>>, %arg3: memref<50x10xf32, #tpu.memory_space<vmem>>, %arg4: memref<2x128xf32, #tpu.memory_space<vmem>>, %arg5: memref<32x10xf32, #tpu.memory_space<vmem>>) attributes {dimension_semantics = [#tpu.dimension_semantics<parallel>], iteration_bounds = array<i64: 2>, scalar_prefetch = 0 : i64, scratch_operands = 0 : i64, tpu.core_type = #tpu.core_type<tc>, window_params = [{transform_indices = @transform_0, window_bounds = array<i64: 32, 784>}, {pipeline_mode = #tpu.pipeline_mode<synchronous>, transform_indices = @transform_1, window_bounds = array<i64: 784, 50>}, {pipeline_mode = #tpu.pipeline_mode<synchronous>, transform_indices = @transform_2, window_bounds = array<i64: 50, 10>}, {pipeline_mode = #tpu.pipeline_mode<synchronous>, transform_indices = @transform_3, window_bounds = array<i64: 2, 128>}, {transform_indices = @transform_4, window_bounds = array<i64: 32, 10>}]} {
    %c0 = arith.constant 0 : index
    %c0_0 = arith.constant 0 : index
    %0 = vector.load %arg1[%c0, %c0_0] : memref<32x784xf32, #tpu.memory_space<vmem>>, vector<32x784xf32>
    %c0_1 = arith.constant 0 : index
    %c0_2 = arith.constant 0 : index
    %1 = vector.load %arg2[%c0_1, %c0_2] : memref<784x50xf32, #tpu.memory_space<vmem>>, vector<784x50xf32>
    %cst = arith.constant dense<0.000000e+00> : vector<32x50xf32>
    %2 = tpu.matmul %0, %1, %cst {dimension_numbers = #tpu.dot_dimension_numbers<[1], [0], [0], [1], [0, 0, 1, 1], [], []>} : vector<32x784xf32>, vector<784x50xf32>, vector<32x50xf32> -> vector<32x50xf32>
    %c0_3 = arith.constant 0 : index
    %c0_4 = arith.constant 0 : index
    %3 = vector.load %arg4[%c0_3, %c0_4] : memref<2x128xf32, #tpu.memory_space<vmem>>, vector<1x50xf32>
    %4 = vector.broadcast %3 : vector<1x50xf32> to vector<32x50xf32>
    %5 = arith.addf %2, %4 : vector<32x50xf32>
    %cst_5 = arith.constant 0.000000e+00 : f32
    %6 = vector.broadcast %cst_5 : f32 to vector<32x50xf32>
    %7 = arith.maximumf %5, %6 : vector<32x50xf32>
    %c0_6 = arith.constant 0 : index
    %c0_7 = arith.constant 0 : index
    %8 = vector.load %arg3[%c0_6, %c0_7] : memref<50x10xf32, #tpu.memory_space<vmem>>, vector<50x10xf32>
    %cst_8 = arith.constant dense<0.000000e+00> : vector<32x10xf32>
    %9 = tpu.matmul %7, %8, %cst_8 {dimension_numbers = #tpu.dot_dimension_numbers<[1], [0], [0], [1], [0, 0, 1, 1], [], []>} : vector<32x50xf32>, vector<50x10xf32>, vector<32x10xf32> -> vector<32x10xf32>
    %c1 = arith.constant 1 : index
    %c0_9 = arith.constant 0 : index
    %10 = vector.load %arg4[%c1, %c0_9] : memref<2x128xf32, #tpu.memory_space<vmem>>, vector<1x10xf32>
    %11 = vector.broadcast %10 : vector<1x10xf32> to vector<32x10xf32>
    %12 = arith.addf %9, %11 : vector<32x10xf32>
    %13 = arith.negf %12 : vector<32x10xf32>
    %14 = math.exp %13 : vector<32x10xf32>
    %cst_10 = arith.constant 1.000000e+00 : f32
    %15 = vector.broadcast %cst_10 : f32 to vector<32x10xf32>
    %16 = arith.addf %15, %14 : vector<32x10xf32>
    %17 = arith.divf %15, %16 : vector<32x10xf32>
    %c0_11 = arith.constant 0 : index
    %c0_12 = arith.constant 0 : index
    %18 = vector.load %arg5[%c0_11, %c0_12] : memref<32x10xf32, #tpu.memory_space<vmem>>, vector<32x10xf32>
    tpu.vector_store %arg5[%c0_11, %c0_12], %17 {strides = array<i32>} : memref<32x10xf32, #tpu.memory_space<vmem>>, vector<32x10xf32>,
    return
  }
  func.func @transform_0(%arg0: i32) -> (i32, i32) {
    %c0_i32 = arith.constant 0 : i32
    %c0_i32_0 = arith.constant 0 : i32
    return %arg0, %c0_i32 : i32, i32
  }
  func.func @transform_1(%arg0: i32) -> (i32, i32) {
    %c0_i32 = arith.constant 0 : i32
    %c0_i32_0 = arith.constant 0 : i32
    %c0_i32_1 = arith.constant 0 : i32
    return %c0_i32, %c0_i32_0 : i32, i32
  }
  func.func @transform_2(%arg0: i32) -> (i32, i32) {
    %c0_i32 = arith.constant 0 : i32
    %c0_i32_0 = arith.constant 0 : i32
    %c0_i32_1 = arith.constant 0 : i32
    return %c0_i32, %c0_i32_0 : i32, i32
  }
  func.func @transform_3(%arg0: i32) -> (i32, i32) {
    %c0_i32 = arith.constant 0 : i32
    %c0_i32_0 = arith.constant 0 : i32
    %c0_i32_1 = arith.constant 0 : i32
    return %c0_i32, %c0_i32_0 : i32, i32
  }
  func.func @transform_4(%arg0: i32) -> (i32, i32) {
    %c0_i32 = arith.constant 0 : i32
    %c0_i32_0 = arith.constant 0 : i32
    return %arg0, %c0_i32 : i32, i32
  }
}

</mosaic_0001>

<bundles_post_ra>
// kernel: tpu_custom_call.1
= control target key start
LH: loop header
LB: loop body
LE: loop exit
PB: predicated region body
PF: predicated region fallthrough
CT: control target
= control target key end

     0   :  { %s1266_s15 = smov 0   ;;  %s1652_s0 = inlined_call_operand.vmem [shape: f32[64,784], index: 0, kind: input, shape index: {}]   ;;  %s1653_s1 = inlined_call_operand.vmem [shape: f32[784,50], index: 1, kind: input, shape index: {}]   ;;  %s1654_s2 = inlined_call_operand.vmem [shape: f32[50,10], index: 2, kind: input, shape index: {}]   ;;  %s1655_s3 = inlined_call_operand.vmem [shape: f32[2,128], index: 3, kind: input, shape index: {}]   ;;  %s1656_s4 = inlined_call_operand.vmem [shape: f32[64,10], index: 4, kind: output, shape index: {}]  }
   0x1 LB: > { %s891_s16 = sadd.s32 4294967295, %s1239_s15   ;;  %p895_p0 = scmp.ge.s32.totalorder %s1239_s15, 1  ;;  %s1239_s15 = sphi %s1266_s15, %s14_s15  }
   0x2   : > { %p164_p1 = scmp.lt.s32.totalorder %s1239_s15, 3 }
   0x4   : > { %p165_p2 = pnand %p895_p0, %p164_p1 }
   0x5   : > { %v248_v0 = vld [vmem:[%s1653_s1 + $0x80] sm:$0xff] (!%p165_p2)  ;;  %v249_v1 = vld [vmem:[%s1653_s1 + $0x88] sm:$0xff] (!%p165_p2)  ;;  %v250_v11 = vld [vmem:[%s1653_s1 + $0x90] sm:$0xff] (!%p165_p2)  ;;  %s1301_s9 = sshll.u32 (!%p165_p2), %s891_s16, 2  ;;  %vm335_vm0 = vcmask (!%p165_p2), 130048   ;;  %vm717_vm1 = vcmask (!%p165_p2), 1041408  }
   0x6   : > { %168 = sbr.rel (%p165_p2) target bundleno = 548 (0x224), region = 36  ;;  %v232_v2 = vld [vmem:[%s1653_s1] sm:$0xff] (!%p165_p2)  ;;  %v1096_v3 = vpack.c.bf16 (!%p165_p2), %v249_v1, %v248_v0  ;;  %v233_v4 = vld [vmem:[%s1653_s1 + $0x8] sm:$0xff] (!%p165_p2)  ;;  %v251_v13 = vld [vmem:[%s1653_s1 + $0x98] sm:$0xff] (!%p165_p2)  ;;  %p192_p3 = scmp.lt.s32.totalorder (!%p165_p2), %s1301_s9, 7  ;;  %vm704_vm2 = vcmask (!%p165_p2), 408576  }
   0x7   : > { %v280_v5 = vld [vmem:[%s1653_s1 + $0x180] sm:$0xff] (!%p165_p2)  ;;  %v281_v6 = vld [vmem:[%s1653_s1 + $0x188] sm:$0xff] (!%p165_p2)  ;;  %v1098_v7 = vpack.c.bf16 (!%p165_p2), %v233_v4, %v232_v2  ;;  %v234_v14 = vld [vmem:[%s1653_s1 + $0x10] sm:$0xff] (!%p165_p2)  ;;  %v1100_v16 = vpack.c.bf16 (!%p165_p2), %v251_v13, %v250_v11  ;;  %vm830_vm3 = vcmask (!%p165_p2), 80896  }
   0x8   : > { %v1128_v8 = vpack.c.bf16 (!%p165_p2), %v281_v6, %v280_v5  ;;  %v264_v9 = vld [vmem:[%s1653_s1 + $0x100] sm:$0xff] (!%p165_p2)  ;;  %v265_v10 = vld [vmem:[%s1653_s1 + $0x108] sm:$0xff] (!%p165_p2)  ;;  %1097 = vmatprep.subr.bf16.mxu0 (!%p165_p2), %v1096_v3  ;;  %v235_v15 = vld [vmem:[%s1653_s1 + $0x18] sm:$0xff] (!%p165_p2) }
   0x9   : > { %v1130_v12 = vpack.c.bf16 (!%p165_p2), %v265_v10, %v264_v9  ;;  %1099 = vmatpush3.bf16.msra.mxu0 (!%p165_p2), %v1098_v7  ;;  %v1102_v17 = vpack.c.bf16 (!%p165_p2), %v235_v15, %v234_v14  ;;  %v282_v18 = vld [vmem:[%s1653_s1 + $0x190] sm:$0xff] (!%p165_p2)  ;;  %v283_v19 = vld [vmem:[%s1653_s1 + $0x198] sm:$0xff] (!%p165_p2)  ;;  %v252_v23 = vld [vmem:[%s1653_s1 + $0xa0] sm:$0xff] (!%p165_p2) }
   0xa   : > { %1129 = vmatprep.subr.bf16.mxu1 (!%p165_p2), %v1128_v8  ;;  %v266_v20 = vld [vmem:[%s1653_s1 + $0x110] sm:$0xff] (!%p165_p2)  ;;  %v1132_v21 = vpack.c.bf16 (!%p165_p2), %v283_v19, %v282_v18  ;;  %v267_v22 = vld [vmem:[%s1653_s1 + $0x118] sm:$0xff] (!%p165_p2)  ;;  %v253_v24 = vld [vmem:[%s1653_s1 + $0xa8] sm:$0xff] (!%p165_p2)  ;;  %1101 = vmatprep.subr.bf16.mxu0 (!%p165_p2), %v1100_v16 }
   0xb   : > { %1131 = vmatpush3.bf16.msra.mxu1 (!%p165_p2), %v1130_v12  ;;  %v1134_v25 = vpack.c.bf16 (!%p165_p2), %v267_v22, %v266_v20  ;;  %v1104_v26 = vpack.c.bf16 (!%p165_p2), %v253_v24, %v252_v23  ;;  %v236_v27 = vld [vmem:[%s1653_s1 + $0x20] sm:$0xff] (!%p165_p2)  ;;  %v237_v28 = vld [vmem:[%s1653_s1 + $0x28] sm:$0xff] (!%p165_p2)  ;;  %v254_v35 = vld [vmem:[%s1653_s1 + $0xb0] sm:$0xff] (!%p165_p2) }
   0xc   : > { %v284_v29 = vld [vmem:[%s1653_s1 + $0x1a0] sm:$0xff] (!%p165_p2)  ;;  %1133 = vmatprep.subr.bf16.mxu1 (!%p165_p2), %v1132_v21  ;;  %v285_v30 = vld [vmem:[%s1653_s1 + $0x1a8] sm:$0xff] (!%p165_p2)  ;;  %v1106_v33 = vpack.c.bf16 (!%p165_p2), %v237_v28, %v236_v27  ;;  %v255_v36 = vld [vmem:[%s1653_s1 + $0xb8] sm:$0xff] (!%p165_p2) }
   0xd   : > { %v268_v31 = vld [vmem:[%s1653_s1 + $0x120] sm:$0xff]  ;;  %v269_v32 = vld [vmem:[%s1653_s1 + $0x128] sm:$0xff]  ;;  %1103 = vmatpush3.bf16.msra.mxu0 %v1102_v17  ;;  %v1136_v34 = vpack.c.bf16 %v285_v30, %v284_v29  ;;  %v238_v37 = vld [vmem:[%s1653_s1 + $0x30] sm:$0xff]  ;;  %v1108_v39 = vpack.c.bf16 %v255_v36, %v254_v35  ;;  %s1658_s9 = smov (!%p192_p3, %s1301_s9), 7 }
   0xe   : > { %1105 = vmatprep.subr.bf16.mxu0 %v1104_v26  ;;  %v1138_v38 = vpack.c.bf16 %v269_v32, %v268_v31  ;;  %v239_v40 = vld [vmem:[%s1653_s1 + $0x38] sm:$0xff]  ;;  %v286_v41 = vld [vmem:[%s1653_s1 + $0x1b0] sm:$0xff]  ;;  %v256_v46 = vld [vmem:[%s1653_s1 + $0xc0] sm:$0xff]  ;;  %s1208_s23 = smul.u32 56, %s1658_s9  ;;  %s899_s24 = sshll.u32 %s1658_s9, 3 }
   0xf   : > { %1135 = vmatpush3.bf16.msra.mxu1 %v1134_v25  ;;  %v287_v42 = vld [vmem:[%s1653_s1 + $0x1b8] sm:$0xff]  ;;  %v270_v44 = vld [vmem:[%s1653_s1 + $0x130] sm:$0xff]  ;;  %v257_v47 = vld [vmem:[%s1653_s1 + $0xc8] sm:$0xff]  ;;  %v1110_v48 = vpack.c.bf16 %v239_v40, %v238_v37  ;;  %s202_s27 = scalar_lea.vmem %s1656_s4, %s899_s24 }
  0x10   : > { %1137 = vmatprep.subr.bf16.mxu1 %v1136_v34  ;;  %v1140_v43 = vpack.c.bf16 %v287_v42, %v286_v41  ;;  %v271_v45 = vld [vmem:[%s1653_s1 + $0x138] sm:$0xff]  ;;  %v288_v49 = vld [vmem:[%s1653_s1 + $0x1c0] sm:$0xff]  ;;  %v289_v50 = vld [vmem:[%s1653_s1 + $0x1c8] sm:$0xff]  ;;  %v1112_v52 = vpack.c.bf16 %v257_v47, %v256_v46  ;;  %s1427_s18 = scalar_lea.vmem %s1652_s0, %s1208_s23 }
  0x11   : > { %1107 = vmatpush3.bf16.msra.mxu0 %v1106_v33  ;;  %v1142_v51 = vpack.c.bf16 %v271_v45, %v270_v44  ;;  %v240_v53 = vld [vmem:[%s1653_s1 + $0x40] sm:$0xff]  ;;  %v241_v54 = vld [vmem:[%s1653_s1 + $0x48] sm:$0xff]  ;;  %v1144_v56 = vpack.c.bf16 %v289_v50, %v288_v49  ;;  %v258_v58 = vld [vmem:[%s1653_s1 + $0xd0] sm:$0xff] }
  0x12   : > { %1109 = vmatprep.subr.bf16.mxu0 %v1108_v39  ;;  %v272_v55 = vld [vmem:[%s1653_s1 + $0x140] sm:$0xff]  ;;  %v273_v57 = vld [vmem:[%s1653_s1 + $0x148] sm:$0xff]  ;;  %v259_v59 = vld [vmem:[%s1653_s1 + $0xd8] sm:$0xff]  ;;  %v1114_v62 = vpack.c.bf16 %v241_v54, %v240_v53 }
  0x13   : > { %1139 = vmatpush3.bf16.msra.mxu1 %v1138_v38  ;;  %v290_v60 = vld [vmem:[%s1653_s1 + $0x1d0] sm:$0xff]  ;;  %v291_v61 = vld [vmem:[%s1653_s1 + $0x1d8] sm:$0xff]  ;;  %v1146_v63 = vpack.c.bf16 %v273_v57, %v272_v55  ;;  %v1116_v0 = vpack.c.bf16 %v259_v59, %v258_v58  ;;  %v260_v6 = vld [vmem:[%s1653_s1 + $0xe0] sm:$0xff] }
  0x14   : > { %1141 = vmatprep.subr.bf16.mxu1 %v1140_v43  ;;  %v242_v1 = vld [vmem:[%s1653_s1 + $0x50] sm:$0xff]  ;;  %v243_v2 = vld [vmem:[%s1653_s1 + $0x58] sm:$0xff]  ;;  %v1148_v4 = vpack.c.bf16 %v291_v61, %v290_v60  ;;  %v261_v7 = vld [vmem:[%s1653_s1 + $0xe8] sm:$0xff] }
  0x15   : > { %1111 = vmatpush3.bf16.msra.mxu0 %v1110_v48  ;;  %v274_v3 = vld [vmem:[%s1653_s1 + $0x150] sm:$0xff]  ;;  %v275_v5 = vld [vmem:[%s1653_s1 + $0x158] sm:$0xff]  ;;  %v292_v8 = vld [vmem:[%s1653_s1 + $0x1e0] sm:$0xff]  ;;  %v1118_v10 = vpack.c.bf16 %v243_v2, %v242_v1  ;;  %v1120_v14 = vpack.c.bf16 %v261_v7, %v260_v6 }
  0x16   : > { %1113 = vmatprep.subr.bf16.mxu0 %v1112_v52  ;;  %v293_v9 = vld [vmem:[%s1653_s1 + $0x1e8] sm:$0xff]  ;;  %v244_v11 = vld [vmem:[%s1653_s1 + $0x60] sm:$0xff]  ;;  %v1150_v13 = vpack.c.bf16 %v275_v5, %v274_v3  ;;  %v262_v19 = vld [vmem:[%s1653_s1 + $0xf0] sm:$0xff] }
  0x17   : > { %1143 = vmatpush3.bf16.msra.mxu1 %v1142_v51  ;;  %v205_v12 = vld [vmem:[%s1427_s18 + $0x8] sm:$0xff]  ;;  %v276_v16 = vld [vmem:[%s1653_s1 + $0x160] sm:$0xff]  ;;  %v1152_v18 = vpack.c.bf16 %v293_v9, %v292_v8  ;;  %v263_v20 = vld [vmem:[%s1653_s1 + $0xf8] sm:$0xff] }
  0x18   : > { %1145 = vmatprep.subr.bf16.mxu1 %v1144_v56  ;;  %v245_v15 = vld [vmem:[%s1653_s1 + $0x68] sm:$0xff]  ;;  %412 = vmatprep.mubr.f32.mxu0 %v205_v12  ;;  %v207_v21 = vld [vmem:[%s1427_s18 + $0x18] sm:$0xff]  ;;  %v294_v22 = vld [vmem:[%s1653_s1 + $0x1f0] sm:$0xff]  ;;  %v1124_v26 = vpack.c.bf16 %v263_v20, %v262_v19 }
  0x19   : > { %1115 = vmatpush3.bf16.msra.mxu0 %v1114_v62  ;;  %v277_v17 = vld [vmem:[%s1653_s1 + $0x168] sm:$0xff]  ;;  %v295_v23 = vld [vmem:[%s1653_s1 + $0x1f8] sm:$0xff]  ;;  %497 = vmatprep.mubr.f32.mxu1 %v207_v21  ;;  %v1122_v24 = vpack.c.bf16 %v245_v15, %v244_v11  ;;  %v246_v27 = vld [vmem:[%s1653_s1 + $0x70] sm:$0xff] }
  0x1a   : > { %1117 = vmatprep.subr.bf16.mxu0 %v1116_v0  ;;  %v1154_v25 = vpack.c.bf16 %v277_v17, %v276_v16  ;;  %v247_v28 = vld [vmem:[%s1653_s1 + $0x78] sm:$0xff]  ;;  %v278_v29 = vld [vmem:[%s1653_s1 + $0x170] sm:$0xff]  ;;  %v1156_v30 = vpack.c.bf16 %v295_v23, %v294_v22  ;;  %v312_v32 = vld [vmem:[%s1653_s1 + $0x280] sm:$0xff] }
  0x1b   : > { %1147 = vmatpush3.bf16.msra.mxu1 %v1146_v63  ;;  %v279_v31 = vld [vmem:[%s1653_s1 + $0x178] sm:$0xff]  ;;  %v313_v33 = vld [vmem:[%s1653_s1 + $0x288] sm:$0xff]  ;;  %v1126_v34 = vpack.c.bf16 %v247_v28, %v246_v27  ;;  %v296_v37 = vld [vmem:[%s1653_s1 + $0x200] sm:$0xff] }
  0x1c   : > { %1149 = vmatprep.subr.bf16.mxu1 %v1148_v4  ;;  %v1158_v35 = vpack.c.bf16 %v279_v31, %v278_v29  ;;  %v1160_v36 = vpack.c.bf16 %v313_v33, %v312_v32  ;;  %v297_v38 = vld [vmem:[%s1653_s1 + $0x208] sm:$0xff]  ;;  %v314_v39 = vld [vmem:[%s1653_s1 + $0x290] sm:$0xff]  ;;  %v315_v40 = vld [vmem:[%s1653_s1 + $0x298] sm:$0xff] }
  0x1d   : > { %1119 = vmatpush3.bf16.msra.mxu0 %v1118_v10  ;;  %v204_v41 = vld [vmem:[%s1427_s18] sm:$0xff]  ;;  %v1162_v42 = vpack.c.bf16 %v297_v38, %v296_v37  ;;  %v206_v43 = vld [vmem:[%s1427_s18 + $0x10] sm:$0xff]  ;;  %v1164_v44 = vpack.c.bf16 %v315_v40, %v314_v39  ;;  %v299_v46 = vld [vmem:[%s1653_s1 + $0x218] sm:$0xff] }
  0x1e   : > { %1121 = vmatprep.subr.bf16.mxu0 %v1120_v14  ;;  %v298_v45 = vld [vmem:[%s1653_s1 + $0x210] sm:$0xff]  ;;  %v316_v47 = vld [vmem:[%s1653_s1 + $0x2a0] sm:$0xff]  ;;  %v317_v48 = vld [vmem:[%s1653_s1 + $0x2a8] sm:$0xff] }
  0x1f   : > { %1151 = vmatpush3.bf16.msra.mxu1 %v1150_v13  ;;  %v212_v49 = vld [vmem:[%s1427_s18 + $0x40] sm:$0xff]  ;;  %v214_v50 = vld [vmem:[%s1427_s18 + $0x50] sm:$0xff]  ;;  %v329_v52 = vld [vmem:[%s1653_s1 + $0x308] sm:$0xff]  ;;  %v1166_v53 = vpack.c.bf16 %v299_v46, %v298_v45  ;;  %v1168_v56 = vpack.c.bf16 %v317_v48, %v316_v47 }
  0x20   : > { %1153 = vmatprep.subr.bf16.mxu1 %v1152_v18  ;;  %v328_v51 = vld [vmem:[%s1653_s1 + $0x300] sm:$0xff]  ;;  %v211_v54 = vld [vmem:[%s1427_s18 + $0x38] sm:$0xff]  ;;  %v301_v58 = vld [vmem:[%s1653_s1 + $0x228] sm:$0xff] }
  0x21   : > { %1123 = vmatpush3.bf16.msra.mxu0 %v1122_v24  ;;  %v1192_v55 = vpack.c.bf16 %v329_v52, %v328_v51  ;;  %v300_v57 = vld [vmem:[%s1653_s1 + $0x220] sm:$0xff]  ;;  %v213_v59 = vld [vmem:[%s1427_s18 + $0x48] sm:$0xff]  ;;  %v318_v60 = vld [vmem:[%s1653_s1 + $0x2b0] sm:$0xff] }
  0x22   : > { %1125 = vmatprep.subr.bf16.mxu0 %v1124_v26  ;;  %v319_v61 = vld [vmem:[%s1653_s1 + $0x2b8] sm:$0xff]  ;;  %v221_v63 = vld [vmem:[%s1427_s18 + $0x88] sm:$0xff]  ;;  %v1170_v0 = vpack.c.bf16 %v301_v58, %v300_v57  ;;  %v218_v1 = vld [vmem:[%s1427_s18 + $0x70] sm:$0xff] }
  0x23   : > { %1155 = vmatpush3.bf16.msra.mxu1 %v1154_v25  ;;  %v219_v62 = vld [vmem:[%s1427_s18 + $0x78] sm:$0xff]  ;;  %v1172_v2 = vpack.c.bf16 %v319_v61, %v318_v60  ;;  %v302_v3 = vld [vmem:[%s1653_s1 + $0x230] sm:$0xff]  ;;  %v220_v5 = vld [vmem:[%s1427_s18 + $0x80] sm:$0xff] }
  0x24   : > { %1157 = vmatprep.subr.bf16.mxu1 %v1156_v30  ;;  %v303_v4 = vld [vmem:[%s1653_s1 + $0x238] sm:$0xff]  ;;  %v320_v6 = vld [vmem:[%s1653_s1 + $0x2c0] sm:$0xff]  ;;  %v321_v7 = vld [vmem:[%s1653_s1 + $0x2c8] sm:$0xff] }
  0x25   : > { %1127 = vmatpush3.bf16.msra.mxu0 %v1126_v34  ;;  %v226_v8 = vld [vmem:[%s1427_s18 + $0xb0] sm:$0xff]  ;;  %v228_v9 = vld [vmem:[%s1427_s18 + $0xc0] sm:$0xff]  ;;  %v1174_v10 = vpack.c.bf16 %v303_v4, %v302_v3  ;;  %v225_v11 = vld [vmem:[%s1427_s18 + $0xa8] sm:$0xff]  ;;  %v1176_v12 = vpack.c.bf16 %v321_v7, %v320_v6 }
  0x26   : > { %1161 = vmatprep.subr.bf16.mxu0 %v1160_v36  ;;  %v304_v13 = vld [vmem:[%s1653_s1 + $0x240] sm:$0xff]  ;;  %v305_v14 = vld [vmem:[%s1653_s1 + $0x248] sm:$0xff]  ;;  %v227_v15 = vld [vmem:[%s1427_s18 + $0xb8] sm:$0xff] }
  0x27   : > { %1159 = vmatpush3.bf16.msra.mxu1 %v1158_v35  ;;  %v322_v16 = vld [vmem:[%s1653_s1 + $0x2d0] sm:$0xff]  ;;  %v323_v17 = vld [vmem:[%s1653_s1 + $0x2d8] sm:$0xff]  ;;  %v209_v18 = vld [vmem:[%s1427_s18 + $0x28] sm:$0xff]  ;;  %v1178_v20 = vpack.c.bf16 %v305_v14, %v304_v13 }
  0x28   : > { %413 = vmatmul.mubr.f32.vlgmr.msra.gmra.mrb[0].mxu0 %v204_v41  ;;  %1193 = vmatprep.subr.bf16.mxu1 %v1192_v55  ;;  %v210_v19 = vld [vmem:[%s1427_s18 + $0x30] sm:$0xff]  ;;  %v1180_v21 = vpack.c.bf16 %v323_v17, %v322_v16  ;;  %v307_v23 = vld [vmem:[%s1653_s1 + $0x258] sm:$0xff]  ;;  %v217_v24 = vld [vmem:[%s1427_s18 + $0x68] sm:$0xff] }
  0x29   : > { %1163 = vmatpush3.bf16.msra.mxu0 %v1162_v42  ;;  %417 = vmatprep.mubr.f32.mxu0 %v212_v49  ;;  %v306_v22 = vld [vmem:[%s1653_s1 + $0x250] sm:$0xff]  ;;  %v324_v25 = vld [vmem:[%s1653_s1 + $0x2e0] sm:$0xff]  ;;  %v325_v26 = vld [vmem:[%s1653_s1 + $0x2e8] sm:$0xff] }
  0x2a   : > { %498 = vmatmul.mubr.f32.vlgmr.msra.gmra.mrb[0].mxu1 %v206_v43  ;;  %1165 = vmatprep.subr.bf16.mxu0 %v1164_v44  ;;  %v224_v27 = vld [vmem:[%s1427_s18 + $0xa0] sm:$0xff]  ;;  %v1182_v28 = vpack.c.bf16 %v307_v23, %v306_v22  ;;  %v1184_v29 = vpack.c.bf16 %v325_v26, %v324_v25  ;;  %v309_v31 = vld [vmem:[%s1653_s1 + $0x268] sm:$0xff]  ;;  %v231_v32 = vld [vmem:[%s1427_s18 + $0xd8] sm:$0xff] }
  0x2b   : > { %502 = vmatprep.mubr.f32.mxu1 %v214_v50  ;;  %1195 = vmatpush3.bf16.msra.mxu1 %v1192_v55  ;;  %v308_v30 = vld [vmem:[%s1653_s1 + $0x260] sm:$0xff]  ;;  %v326_v33 = vld [vmem:[%s1653_s1 + $0x2f0] sm:$0xff]  ;;  %v327_v34 = vld [vmem:[%s1653_s1 + $0x2f8] sm:$0xff] }
  0x2c   : > { %418 = vmatmul.mubr.f32.gmra.mrb[2].mxu0 %v211_v54  ;;  %v1186_v35 = vpack.c.bf16 %v309_v31, %v308_v30  ;;  %v1188_v36 = vpack.c.bf16 %v327_v34, %v326_v33  ;;  %v310_v37 = vld [vmem:[%s1653_s1 + $0x270] sm:$0xff]  ;;  %v311_v38 = vld [vmem:[%s1653_s1 + $0x278] sm:$0xff]  ;;  %v208_v40 = vld [vmem:[%s1427_s18 + $0x20] sm:$0xff] }
  0x2d   : > { %1167 = vmatpush3.bf16.msra.mxu0 %v1166_v53  ;;  %422 = vmatprep.mubr.f32.mxu0 %v219_v62  ;;  %v1190_v39 = vpack.c.bf16 %v311_v38, %v310_v37  ;;  %v216_v41 = vld [vmem:[%s1427_s18 + $0x60] sm:$0xff]  ;;  %v215_v42 = vld [vmem:[%s1427_s18 + $0x58] sm:$0xff]  ;;  %v222_v44 = vld [vmem:[%s1427_s18 + $0x90] sm:$0xff] }
  0x2e   : > { %503 = vmatmul.mubr.f32.gmra.mrb[2].mxu1 %v213_v59  ;;  %1169 = vmatprep.subr.bf16.mxu0 %v1168_v56  ;;  %v223_v43 = vld [vmem:[%s1427_s18 + $0x98] sm:$0xff]  ;;  %v230_v45 = vld [vmem:[%s1427_s18 + $0xd0] sm:$0xff]  ;;  %v229_v46 = vld [vmem:[%s1427_s18 + $0xc8] sm:$0xff] }
  0x2f   : > { %507 = vmatprep.mubr.f32.mxu1 %v221_v63  ;;  %v692_v47 = vld [vmem:[%s1654_s2] sm:$0xff]  ;;  %v693_v48 = vld [vmem:[%s1654_s2 + $0x8] sm:$0xff]  ;;  %v694_v50 = vld [vmem:[%s1654_s2 + $0x10] sm:$0xff] }
  0x30   : > { %423 = vmatmul.mubr.f32.gmra.mrb[4].mxu0 %v218_v1  ;;  %v1196_v49 = vpack.c.bf16 %v693_v48, %v692_v47  ;;  %v695_v51 = vld [vmem:[%s1654_s2 + $0x18] sm:$0xff]  ;;  %v696_v53 = vld [vmem:[%s1654_s2 + $0x20] sm:$0xff]  ;;  %v697_v54 = vld [vmem:[%s1654_s2 + $0x28] sm:$0xff] }
  0x31   : > { %1171 = vmatpush3.bf16.msra.mxu0 %v1170_v0  ;;  %427 = vmatprep.mubr.f32.mxu0 %v226_v8  ;;  %v1200_v52 = vpack.c.bf16 %v695_v51, %v694_v50  ;;  %v1204_v55 = vpack.c.bf16 %v697_v54, %v696_v53  ;;  %v698_v56 = vld [vmem:[%s1654_s2 + $0x30] sm:$0x3]  ;;  %v900_v58 = vld [vmem:[%s1655_s3] ss:$0 sm:$0xff]  ;;  %v905_v54 = vld [vmem:[%s1655_s3 + $0x1] ss:$0 sm:$0xff] }
  0x32   : > { %508 = vmatmul.mubr.f32.gmra.mrb[4].mxu1 %v220_v5  ;;  %1173 = vmatprep.subr.bf16.mxu0 %v1172_v2 }
  0x33   : > { %512 = vmatprep.mubr.f32.mxu1 %v228_v9  ;;  %1197 = vmatprep.subr.bf16.mxu1 %v1196_v49 }
  0x34   : > { %428 = vmatmul.mubr.f32.gmra.mrb[6].mxu0 %v225_v11 }
  0x35   : > { %1175 = vmatpush3.bf16.msra.mxu0 %v1174_v10  ;;  %582 = vmatprep.mubr.f32.mxu0 %v209_v18 }
  0x36   : > { %513 = vmatmul.mubr.f32.gmra.mrb[6].mxu1 %v227_v15  ;;  %1177 = vmatprep.subr.bf16.mxu0 %v1176_v12 }
  0x37   : > { %1070 = vmatprep.mubr.msk.f32.mxu1 %vm335_vm0, %v210_v19 }
  0x39   : > { %1179 = vmatpush3.bf16.msra.mxu0 %v1178_v20 }
  0x3a   : > { %1071 = vmatmul.mubr.msk.f32.vlgmr.msra.gmra.mrb[8].mxu1 %vm335_vm0, %v217_v24  ;;  %1181 = vmatprep.subr.bf16.mxu0 %v1180_v21 }
  0x3b   : > { %1073 = vmatprep.mubr.msk.f32.mxu1 %vm335_vm0, %v224_v27  ;;  %1199 = vmatpush3.bf16.msra.mxu1 %v1196_v49 }
  0x3c   : > { %1201 = vmatprep.subr.bf16.mxu1 %v1200_v52 }
  0x3d   : > { %1183 = vmatpush3.bf16.msra.mxu0 %v1182_v28 }
  0x3e   : > { %1074 = vmatmul.mubr.msk.f32.gmra.mrb[10].mxu1 %vm335_vm0, %v231_v32  ;;  %1185 = vmatprep.subr.bf16.mxu0 %v1184_v29 }
  0x3f   : > { %1203 = vmatpush3.bf16.msra.mxu1 %v1200_v52 }
  0x40   : > { %1205 = vmatprep.subr.bf16.mxu1 %v1204_v55 }
  0x41   : > { %1187 = vmatpush3.bf16.msra.mxu0 %v1186_v35 }
  0x42   : > { %1189 = vmatprep.subr.bf16.mxu0 %v1188_v36 }
  0x43   : > { %1207 = vmatpush3.bf16.msra.mxu1 %v1204_v55 }
  0x44   : > { %1088 = vmatprep.subr.msk.mxu1 %vm717_vm1, %v698_v56 }
  0x45   : > { %1191 = vmatpush3.bf16.msra.mxu0 %v1190_v39 }
  0x47   : > { %1089 = vmatpush3.msk.msra.mxu1 %vm717_vm1, %v698_v56 }
  0x48   : > { %583 = vmatmul.mubr.f32.vlgmr.msra.gmra.mrb[8].mxu0 %v208_v40 }
  0x49   : > { %587 = vmatprep.mubr.f32.mxu0 %v216_v41 }
  0x4c   : > { %588 = vmatmul.mubr.f32.gmra.mrb[10].mxu0 %v215_v42 }
  0x4d   : > { %592 = vmatprep.mubr.f32.mxu0 %v223_v43 }
  0x50   : > { %593 = vmatmul.mubr.f32.gmra.mrb[12].mxu0 %v222_v44 }
  0x51   : > { %597 = vmatprep.mubr.f32.mxu0 %v230_v45 }
  0x54   : > { %598 = vmatmul.mubr.f32.gmra.mrb[14].mxu0 %v229_v46 }
  0xfb   : > { %v949_v57 = vpop.f32.mrb[0].mxu0 }
  0xfc   : > { %v950_v59 = vpop.f32.mrb[1].mxu0 }
  0xfd   : > { %v993_v60 = vpop.f32.mrb[0].mxu1  ;;  %v951_v61 = vadd.f32 %v950_v59, %v949_v57 }
  0xfe   : > { %v994_v62 = vpop.f32.mrb[1].mxu1 }
  0xff   : > { %v995_v63 = vadd.f32 %v994_v62, %v993_v60  ;;  %v415_v0 = vadd.f32 %v951_v61, %v900_v58  ;;  %v952_v1 = vpop.f32.mrb[2].mxu0 }
 0x100   : > { %v953_v2 = vpop.f32.mrb[3].mxu0 }
 0x101   : > { %v996_v3 = vpop.f32.mrb[2].mxu1  ;;  %v500_v4 = vadd.f32 %v995_v63, %v415_v0  ;;  %v954_v5 = vadd.f32 %v953_v2, %v952_v1 }
 0x102   : > { %v997_v6 = vpop.f32.mrb[3].mxu1 }
 0x103   : > { %v998_v7 = vadd.f32 %v997_v6, %v996_v3  ;;  %v420_v8 = vadd.f32 %v954_v5, %v900_v58  ;;  %v955_v9 = vpop.f32.mrb[4].mxu0 }
 0x104   : > { %v956_v10 = vpop.f32.mrb[5].mxu0 }
 0x105   : > { %v999_v11 = vpop.f32.mrb[4].mxu1  ;;  %v505_v12 = vadd.f32 %v998_v7, %v420_v8  ;;  %v957_v13 = vadd.f32 %v956_v10, %v955_v9 }
 0x106   : > { %v1000_v14 = vpop.f32.mrb[5].mxu1 }
 0x107   : > { %v1001_v15 = vadd.f32 %v1000_v14, %v999_v11  ;;  %v425_v16 = vadd.f32 %v957_v13, %v900_v58  ;;  %v958_v17 = vpop.f32.mrb[6].mxu0 }
 0x108   : > { %v959_v18 = vpop.f32.mrb[7].mxu0 }
 0x109   : > { %v1002_v19 = vpop.f32.mrb[6].mxu1  ;;  %v510_v20 = vadd.f32 %v1001_v15, %v425_v16  ;;  %v960_v21 = vadd.f32 %v959_v18, %v958_v17 }
 0x10a   : > { %v1003_v22 = vpop.f32.mrb[7].mxu1 }
 0x10b   : > { %v1004_v23 = vadd.f32 %v1003_v22, %v1002_v19  ;;  %v430_v24 = vadd.f32 %v960_v21, %v900_v58 }
 0x10d   : > { %v1072_v25 = vpop.f32.mrb[8].mxu1  ;;  %v515_v26 = vadd.f32 %v1004_v23, %v430_v24 }
 0x10e   : > { %v669_v27 = vpop.f32.mrb[9].mxu1 }
 0x111   : > { %v1075_v28 = vpop.f32.mrb[10].mxu1 }
 0x112   : > { %v679_v29 = vpop.f32.mrb[11].mxu1 }
 0x11b   : > { %v1037_v30 = vpop.f32.mrb[8].mxu0 }
 0x11c   : > { %v1038_v31 = vpop.f32.mrb[9].mxu0 }
 0x11d   : > { %v1039_v32 = vadd.f32 %v1038_v31, %v1037_v30 }
 0x11f   : > { %v1040_v33 = vpop.f32.mrb[10].mxu0  ;;  %v585_v34 = vadd.f32 %v1039_v32, %v500_v4 }
 0x120   : > { %v1041_v35 = vpop.f32.mrb[11].mxu0 }
 0x121   : > { %v1042_v36 = vadd.f32 %v1041_v35, %v1040_v33  ;;  %v670_v37 = vadd.f32 %v669_v27, %v585_v34 }
 0x123   : > { %v590_v38 = vadd.f32 %v1042_v36, %v505_v12  ;;  %v688_v39 = vmax.f32 %v670_v37, 0.0  ;;  %v1043_v40 = vpop.f32.mrb[12].mxu0 }
 0x124   : > { %v1044_v41 = vpop.f32.mrb[13].mxu0 }
 0x125   : > { %v675_v42 = vadd.f32 %v1072_v25, %v590_v38  ;;  %v1045_v43 = vadd.f32 %v1044_v41, %v1043_v40  ;;  %1090 = vmatprep.mubr.msk.f32.mxu1 %vm704_vm2, %v688_v39 }
 0x127   : > { %v689_v44 = vmax.f32 %v675_v42, 0.0  ;;  %v1046_v45 = vpop.f32.mrb[14].mxu0  ;;  %v595_v46 = vadd.f32 %v1045_v43, %v510_v20 }
 0x128   : > { %v1047_v47 = vpop.f32.mrb[15].mxu0 }
 0x129   : > { %v1048_v48 = vadd.f32 %v1047_v47, %v1046_v45  ;;  %v680_v49 = vadd.f32 %v679_v29, %v595_v46  ;;  %1091 = vmatmul.mubr.msk.f32.vlgmr.msra.gmra.mrb[12].mxu1 %vm704_vm2, %v689_v44 }
 0x12b   : > { %v600_v50 = vadd.f32 %v1048_v48, %v515_v26  ;;  %v690_v51 = vmax.f32 %v680_v49, 0.0 }
 0x12d   : > { %v685_v52 = vadd.f32 %v1075_v28, %v600_v50  ;;  %1093 = vmatprep.mubr.msk.f32.mxu1 %vm704_vm2, %v690_v51 }
 0x12f   : > { %v691_v53 = vmax.f32 %v685_v52, 0.0 }
 0x131   : > { %1094 = vmatmul.mubr.msk.f32.gmra.mrb[14].mxu1 %vm704_vm2, %v691_v53 }
 0x1fc   : > { %v1092_v55 = vpop.f32.mrb[12].mxu1 }
 0x1fd   : > { %v793_v56 = vadd.f32 %v1092_v55, %v905_v54  ;;  %v787_v57 = vpop.f32.mrb[13].mxu1 }
 0x1fe   : > { %v788_v58 = vadd.f32 %v905_v54, %v787_v57 }
 0x1ff   : > { %v912_v59 = vmul.f32 -1.442695, %v793_v56 }
 0x200   : > { %v911_v60 = vmul.f32 -1.442695, %v788_v58 }
 0x201   : > { %1217 = vpow2.f32 %v912_v59 }
 0x202   : > { %1219 = vpow2.f32 %v911_v60 }
 0x204   : > { %v1095_v61 = vpop.f32.mrb[14].mxu1 }
 0x205   : > { %v803_v62 = vadd.f32 %v1095_v61, %v905_v54  ;;  %v797_v63 = vpop.f32.mrb[15].mxu1 }
 0x206   : > { %v798_v0 = vadd.f32 %v905_v54, %v797_v63 }
 0x207   : > { %v914_v1 = vmul.f32 -1.442695, %v803_v62 }
 0x208   : > { %v913_v2 = vmul.f32 -1.442695, %v798_v0 }
 0x209   : > { %1221 = vpow2.f32 %v914_v1 }
 0x20a   : > { %1223 = vpow2.f32 %v913_v2 }
 0x20b   : > { %v1218_v3 = vpop.eup %1217 }
 0x20c   : > { %v1220_v4 = vpop.eup %1219  ;;  %v819_v5 = vadd.f32 1.0, %v1218_v3 }
 0x20d   : > { %v818_v6 = vadd.f32 1.0, %v1220_v4 }
 0x20f   : > { %1225 = vrcp.f32 %v818_v6 }
 0x210   : > { %1227 = vrcp.f32 %v819_v5 }
 0x213   : > { %v1222_v7 = vpop.eup %1221 }
 0x214   : > { %v1224_v8 = vpop.eup %1223  ;;  %v821_v9 = vadd.f32 1.0, %v1222_v7 }
 0x215   : > { %v820_v10 = vadd.f32 1.0, %v1224_v8 }
 0x217   : > { %1229 = vrcp.f32 %v820_v10 }
 0x218   : > { %1231 = vrcp.f32 %v821_v9 }
 0x219   : > { %v1226_v11 = vpop.eup %1225 }
 0x21a   : > { %v1228_v12 = vpop.eup %1227  ;;  %831 = vst.msk [vmem:[%s202_s27] sm:$0xff] %vm830_vm3, %v1226_v11 }
 0x21b   : > { %832 = vst.msk [vmem:[%s202_s27 + $0x8] sm:$0xff] %vm830_vm3, %v1228_v12 }
 0x221   : > { %v1230_v13 = vpop.eup %1229 }
 0x222   : > { %v1232_v14 = vpop.eup %1231  ;;  %833 = vst.msk [vmem:[%s202_s27 + $0x10] sm:$0xff] %vm830_vm3, %v1230_v13 }
 0x223   : > { %834 = vst.msk [vmem:[%s202_s27 + $0x18] sm:$0xff] %vm830_vm3, %v1232_v14 }
 0x224 PF: > { %s14_s15 = sadd.s32 1, %s1239_s15  }
 0x225   : > { %p11_p4 = scmp.ge.s32.totalorder %s14_s15, 4  }
 0x227   :  { %13 = sbr.rel (!%p11_p4) target bundleno = 1 (0x1), region = 66 }

</bundles_post_ra>
